<compile_context>
chip_gen: v6e
topology: v6e:2x2x1
jax: 0.10.0
libtpu: 0.0.40
codegen_flags: <defaults>
</compile_context>

<pallas_src>
import jax
import jax.numpy as jnp
from jax.experimental import pallas as pl
from jax.experimental.pallas import tpu as pltpu


def _round_up(x, m):
    return ((x + m - 1) // m) * m


def dann_kernel(x_ref, we_ref, be_ref, w1_ref, b1_ref, w2_ref, b2_ref, out_ref):
    # In-kernel bf16 cast of x (avoids a separate wrapper-side HBM cast pass).
    x = x_ref[...].astype(jnp.bfloat16)                               # (TB, F)

    # --- embedding_layers: Linear + ReLU (bf16 operands, f32 accumulate) ---
    emb = jnp.dot(x, we_ref[...], preferred_element_type=jnp.float32) + be_ref[...]
    emb = jnp.maximum(emb, 0.0)                                       # (TB, EMB_P)

    # --- GradReverse: identity in the forward pass (no op emitted) ---

    # --- discriminator_layers: Linear -> ReLU -> Linear (all 128-lane dense) ---
    h = jnp.dot(emb.astype(jnp.bfloat16), w1_ref[...],
                preferred_element_type=jnp.float32) + b1_ref[...]
    h = jnp.maximum(h, 0.0)                                           # (TB, HID_P)
    out = jnp.dot(h.astype(jnp.bfloat16), w2_ref[...],
                  preferred_element_type=jnp.float32) + b2_ref[...]

    # bf16 writeback: halves the dominant HBM store stream; wrapper upcasts.
    out_ref[...] = out.astype(out_ref.dtype)                          # (TB, OUT_P)


def prepare_params(params, n_domains):
    """One-time weight prep: pad feature dims to 128 lanes, cast MXU operands to bf16.

    Zero-padded columns + zero bias => padded activation columns are exactly 0,
    so slicing [:, :n_domains] at the end recovers the exact unpadded result.
    """
    we, be, w1, b1, w2, b2 = params
    f_in, emb = we.shape
    hid = w1.shape[1]
    emb_p = _round_up(emb, 128)
    hid_p = _round_up(hid, 128)
    out_p = _round_up(n_domains, 128)

    def pad2(a, rows, cols):
        return jnp.zeros((rows, cols), a.dtype).at[: a.shape[0], : a.shape[1]].set(a)

    wep = pad2(we, f_in, emb_p).astype(jnp.bfloat16)
    bep = pad2(be, 1, emb_p)                       # biases stay f32 (added post-accumulate)
    w1p = pad2(w1, emb_p, hid_p).astype(jnp.bfloat16)
    b1p = pad2(b1, 1, hid_p)
    w2p = pad2(w2, hid_p, out_p).astype(jnp.bfloat16)
    b2p = pad2(b2, 1, out_p)
    return wep, bep, w1p, b1p, w2p, b2p


def dann_forward(x, prepared_params, *, n_domains, tb=1024):
    """Fused DANN forward. `prepared_params` must come from prepare_params()."""
    we, be, w1, b1, w2, b2 = prepared_params
    B, F = x.shape
    EMB_P = we.shape[1]
    HID_P = w1.shape[1]
    OUT_P = w2.shape[1]

    # Batch tiling: multiples of 16 (bf16 sublane packing); cap TB so the single
    # "parallel" grid axis yields >= 2 tiles whenever the batch is big enough
    # (lets v7x's 2 TensorCores both work).
    b_round = _round_up(B, 16)
    TB = min(tb, b_round)
    if b_round // TB < 2 and b_round >= 32:
        TB = _round_up((b_round + 1) // 2, 16)
    n_tiles = (b_round + TB - 1) // TB
    B_pad = n_tiles * TB
    if B_pad != B:
        x = jnp.pad(x, ((0, B_pad - B), (0, 0)))   # padded rows sliced off below

    # Explicit scoped-VMEM budget: resident weights (double-buffered by default)
    # + double-buffered x / out tiles, with headroom. Keeps large-TB configs safe
    # on v5e's 16 MiB default scoped limit and within v7x's 64 MiB physical VMEM.
    weight_bytes = sum(int(a.size) * a.dtype.itemsize for a in (we, be, w1, b1, w2, b2))
    tile_bytes = TB * F * 4 + TB * OUT_P * 2
    vmem_limit = min(64 << 20, max(32 << 20, 2 * (weight_bytes + tile_bytes) + (4 << 20)))

    flops = 2 * B_pad * (F * EMB_P + EMB_P * HID_P + HID_P * OUT_P)
    bytes_accessed = (
        B_pad * F * 4            # x read (f32)
        + weight_bytes           # resident weights/biases
        + B_pad * OUT_P * 2      # bf16 output writeback
    )

    out_pad = pl.pallas_call(
        dann_kernel,
        out_shape=jax.ShapeDtypeStruct((B_pad, OUT_P), jnp.bfloat16),
        grid=(n_tiles,),
        in_specs=[
            pl.BlockSpec((TB, F), lambda i: (i, 0)),          # x: tiled along batch
            pl.BlockSpec((F, EMB_P), lambda i: (0, 0)),       # weights/biases: resident
            pl.BlockSpec((1, EMB_P), lambda i: (0, 0)),
            pl.BlockSpec((EMB_P, HID_P), lambda i: (0, 0)),
            pl.BlockSpec((1, HID_P), lambda i: (0, 0)),
            pl.BlockSpec((HID_P, OUT_P), lambda i: (0, 0)),
            pl.BlockSpec((1, OUT_P), lambda i: (0, 0)),
        ],
        out_specs=pl.BlockSpec((TB, OUT_P), lambda i: (i, 0)),
        compiler_params=pltpu.CompilerParams(
            dimension_semantics=("parallel",),
            vmem_limit_bytes=int(vmem_limit),
        ),
        cost_estimate=pl.CostEstimate(
            flops=flops, transcendentals=0, bytes_accessed=bytes_accessed),
    )(x, we, be, w1, b1, w2, b2)

    return out_pad[:B, :n_domains].astype(jnp.float32)


def init_params(key, in_features, embedding_num, hidden, n_domains):
    """Deterministic parameter init (uniform, PyTorch-Linear-style bounds)."""
    ks = jax.random.split(key, 6)

    def linear(kw, kb, fan_in, fan_out):
        bound = 1.0 / jnp.sqrt(fan_in)
        w = jax.random.uniform(kw, (fan_in, fan_out), jnp.float32, -bound, bound)
        b = jax.random.uniform(kb, (1, fan_out), jnp.float32, -bound, bound)
        return w, b

    we, be = linear(ks[0], ks[1], in_features, embedding_num)   # embedding_layers
    w1, b1 = linear(ks[2], ks[3], embedding_num, hidden)        # discriminator hidden
    w2, b2 = linear(ks[4], ks[5], hidden, n_domains)            # discriminator output
    return we, be, w1, b1, w2, b2


def dann_ref(x, params):
    """Pure-JAX reference with the same bf16-operand / f32-accumulate numerics."""
    we, be, w1, b1, w2, b2 = params
    xb = x.astype(jnp.bfloat16)
    emb = jnp.dot(xb, we.astype(jnp.bfloat16),
                  preferred_element_type=jnp.float32) + be
    emb = jnp.maximum(emb, 0.0)
    # GradReverse forward = identity
    h = jnp.dot(emb.astype(jnp.bfloat16), w1.astype(jnp.bfloat16),
                preferred_element_type=jnp.float32) + b1
    h = jnp.maximum(h, 0.0)
    return jnp.dot(h.astype(jnp.bfloat16), w2.astype(jnp.bfloat16),
                   preferred_element_type=jnp.float32) + b2


if __name__ == "__main__":
    key = jax.random.PRNGKey(0)
    kx, kp = jax.random.split(key)

    B, IN_FEATURES = 8, 32
    EMBEDDING_NUM = 64          # model.embedding_num
    HIDDEN_NODE = 32            # hidden_node = [32]
    N_DOMAINS = 4               # n_domains

    x = jax.random.normal(kx, (B, IN_FEATURES), jnp.float32)
    params = init_params(kp, IN_FEATURES, EMBEDDING_NUM, HIDDEN_NODE, N_DOMAINS)
    prepped = prepare_params(params, N_DOMAINS)   # one-time prep, not per forward call

    out = dann_forward(x, prepped, n_domains=N_DOMAINS)
    out = jax.block_until_ready(out)

    ref = dann_ref(x, params)
    assert out.shape == (B, N_DOMAINS)
    # Tolerance covers the bf16 MXU operands and the bf16 output writeback rounding.
    assert jnp.allclose(out, ref, atol=2e-2, rtol=2e-2), "mismatch vs reference"

    print("KERNEL_OK")
</pallas_src>

<mosaic_0001>
module attributes {stable_mosaic.version = 11 : i64} {
  func.func @dann_kernel(%arg0: i32, %arg1: memref<16x32xf32, #tpu.memory_space<vmem>>, %arg2: memref<32x128xbf16, #tpu.memory_space<vmem>>, %arg3: memref<1x128xf32, #tpu.memory_space<vmem>>, %arg4: memref<128x128xbf16, #tpu.memory_space<vmem>>, %arg5: memref<1x128xf32, #tpu.memory_space<vmem>>, %arg6: memref<128x128xbf16, #tpu.memory_space<vmem>>, %arg7: memref<1x128xf32, #tpu.memory_space<vmem>>, %arg8: memref<16x128xbf16, #tpu.memory_space<vmem>>) attributes {dimension_semantics = [#tpu.dimension_semantics<parallel>], iteration_bounds = array<i64: 1>, scalar_prefetch = 0 : i64, scratch_operands = 0 : i64, tpu.core_type = #tpu.core_type<tc>, window_params = [{transform_indices = @transform_0, window_bounds = array<i64: 16, 32>}, {pipeline_mode = #tpu.pipeline_mode<synchronous>, transform_indices = @transform_1, window_bounds = array<i64: 32, 128>}, {pipeline_mode = #tpu.pipeline_mode<synchronous>, transform_indices = @transform_2, window_bounds = array<i64: 1, 128>}, {pipeline_mode = #tpu.pipeline_mode<synchronous>, transform_indices = @transform_3, window_bounds = array<i64: 128, 128>}, {pipeline_mode = #tpu.pipeline_mode<synchronous>, transform_indices = @transform_4, window_bounds = array<i64: 1, 128>}, {pipeline_mode = #tpu.pipeline_mode<synchronous>, transform_indices = @transform_5, window_bounds = array<i64: 128, 128>}, {pipeline_mode = #tpu.pipeline_mode<synchronous>, transform_indices = @transform_6, window_bounds = array<i64: 1, 128>}, {transform_indices = @transform_7, window_bounds = array<i64: 16, 128>}]} {
    %c0 = arith.constant 0 : index
    %c0_0 = arith.constant 0 : index
    %0 = vector.load %arg1[%c0, %c0_0] : memref<16x32xf32, #tpu.memory_space<vmem>>, vector<16x32xf32>
    %1 = arith.truncf %0 : vector<16x32xf32> to vector<16x32xbf16>
    %c0_1 = arith.constant 0 : index
    %c0_2 = arith.constant 0 : index
    %2 = vector.load %arg2[%c0_1, %c0_2] : memref<32x128xbf16, #tpu.memory_space<vmem>>, vector<32x128xbf16>
    %cst = arith.constant dense<0.000000e+00> : vector<16x128xf32>
    %3 = tpu.matmul %1, %2, %cst {dimension_numbers = #tpu.dot_dimension_numbers<[1], [0], [0], [1], [0, 0, 1, 1], [], []>} : vector<16x32xbf16>, vector<32x128xbf16>, vector<16x128xf32> -> vector<16x128xf32>
    %c0_3 = arith.constant 0 : index
    %c0_4 = arith.constant 0 : index
    %4 = vector.load %arg3[%c0_3, %c0_4] : memref<1x128xf32, #tpu.memory_space<vmem>>, vector<1x128xf32>
    %5 = vector.broadcast %4 : vector<1x128xf32> to vector<16x128xf32>
    %6 = arith.addf %3, %5 : vector<16x128xf32>
    %cst_5 = arith.constant 0.000000e+00 : f32
    %7 = vector.broadcast %cst_5 : f32 to vector<16x128xf32>
    %8 = arith.maximumf %6, %7 : vector<16x128xf32>
    %9 = arith.truncf %8 : vector<16x128xf32> to vector<16x128xbf16>
    %c0_6 = arith.constant 0 : index
    %c0_7 = arith.constant 0 : index
    %10 = vector.load %arg4[%c0_6, %c0_7] : memref<128x128xbf16, #tpu.memory_space<vmem>>, vector<128x128xbf16>
    %cst_8 = arith.constant dense<0.000000e+00> : vector<16x128xf32>
    %11 = tpu.matmul %9, %10, %cst_8 {dimension_numbers = #tpu.dot_dimension_numbers<[1], [0], [0], [1], [0, 0, 1, 1], [], []>} : vector<16x128xbf16>, vector<128x128xbf16>, vector<16x128xf32> -> vector<16x128xf32>
    %c0_9 = arith.constant 0 : index
    %c0_10 = arith.constant 0 : index
    %12 = vector.load %arg5[%c0_9, %c0_10] : memref<1x128xf32, #tpu.memory_space<vmem>>, vector<1x128xf32>
    %13 = vector.broadcast %12 : vector<1x128xf32> to vector<16x128xf32>
    %14 = arith.addf %11, %13 : vector<16x128xf32>
    %cst_11 = arith.constant 0.000000e+00 : f32
    %15 = vector.broadcast %cst_11 : f32 to vector<16x128xf32>
    %16 = arith.maximumf %14, %15 : vector<16x128xf32>
    %17 = arith.truncf %16 : vector<16x128xf32> to vector<16x128xbf16>
    %c0_12 = arith.constant 0 : index
    %c0_13 = arith.constant 0 : index
    %18 = vector.load %arg6[%c0_12, %c0_13] : memref<128x128xbf16, #tpu.memory_space<vmem>>, vector<128x128xbf16>
    %cst_14 = arith.constant dense<0.000000e+00> : vector<16x128xf32>
    %19 = tpu.matmul %17, %18, %cst_14 {dimension_numbers = #tpu.dot_dimension_numbers<[1], [0], [0], [1], [0, 0, 1, 1], [], []>} : vector<16x128xbf16>, vector<128x128xbf16>, vector<16x128xf32> -> vector<16x128xf32>
    %c0_15 = arith.constant 0 : index
    %c0_16 = arith.constant 0 : index
    %20 = vector.load %arg7[%c0_15, %c0_16] : memref<1x128xf32, #tpu.memory_space<vmem>>, vector<1x128xf32>
    %21 = vector.broadcast %20 : vector<1x128xf32> to vector<16x128xf32>
    %22 = arith.addf %19, %21 : vector<16x128xf32>
    %23 = arith.truncf %22 : vector<16x128xf32> to vector<16x128xbf16>
    %c0_17 = arith.constant 0 : index
    %c0_18 = arith.constant 0 : index
    %24 = vector.load %arg8[%c0_17, %c0_18] : memref<16x128xbf16, #tpu.memory_space<vmem>>, vector<16x128xbf16>
    tpu.vector_store %arg8[%c0_17, %c0_18], %23 {strides = array<i32>} : memref<16x128xbf16, #tpu.memory_space<vmem>>, vector<16x128xbf16>,
    return
  }
  func.func @transform_0(%arg0: i32) -> (i32, i32) {
    %c0_i32 = arith.constant 0 : i32
    %c0_i32_0 = arith.constant 0 : i32
    return %arg0, %c0_i32 : i32, i32
  }
  func.func @transform_1(%arg0: i32) -> (i32, i32) {
    %c0_i32 = arith.constant 0 : i32
    %c0_i32_0 = arith.constant 0 : i32
    %c0_i32_1 = arith.constant 0 : i32
    return %c0_i32, %c0_i32_0 : i32, i32
  }
  func.func @transform_2(%arg0: i32) -> (i32, i32) {
    %c0_i32 = arith.constant 0 : i32
    %c0_i32_0 = arith.constant 0 : i32
    %c0_i32_1 = arith.constant 0 : i32
    return %c0_i32, %c0_i32_0 : i32, i32
  }
  func.func @transform_3(%arg0: i32) -> (i32, i32) {
    %c0_i32 = arith.constant 0 : i32
    %c0_i32_0 = arith.constant 0 : i32
    %c0_i32_1 = arith.constant 0 : i32
    return %c0_i32, %c0_i32_0 : i32, i32
  }
  func.func @transform_4(%arg0: i32) -> (i32, i32) {
    %c0_i32 = arith.constant 0 : i32
    %c0_i32_0 = arith.constant 0 : i32
    %c0_i32_1 = arith.constant 0 : i32
    return %c0_i32, %c0_i32_0 : i32, i32
  }
  func.func @transform_5(%arg0: i32) -> (i32, i32) {
    %c0_i32 = arith.constant 0 : i32
    %c0_i32_0 = arith.constant 0 : i32
    %c0_i32_1 = arith.constant 0 : i32
    return %c0_i32, %c0_i32_0 : i32, i32
  }
  func.func @transform_6(%arg0: i32) -> (i32, i32) {
    %c0_i32 = arith.constant 0 : i32
    %c0_i32_0 = arith.constant 0 : i32
    %c0_i32_1 = arith.constant 0 : i32
    return %c0_i32, %c0_i32_0 : i32, i32
  }
  func.func @transform_7(%arg0: i32) -> (i32, i32) {
    %c0_i32 = arith.constant 0 : i32
    %c0_i32_0 = arith.constant 0 : i32
    return %arg0, %c0_i32 : i32, i32
  }
}

</mosaic_0001>

<bundles_post_ra>
// kernel: tpu_custom_call.1
= control target key start
LH: loop header
LB: loop body
LE: loop exit
PB: predicated region body
PF: predicated region fallthrough
CT: control target
= control target key end

     0   :  { %12 = vsyncpa [#allocation3], 0  ;;  %s761_s0 = inlined_call_operand.hbm [shape: f32[16,32], index: 0, kind: input, shape index: {}]   ;;  %s762_s1 = inlined_call_operand.hbm [shape: bf16[32,128], index: 1, kind: input, shape index: {}]   ;;  %s763_s2 = inlined_call_operand.vmem [shape: f32[1,128], index: 2, kind: input, shape index: {}]   ;;  %s764_s3 = inlined_call_operand.hbm [shape: bf16[128,128], index: 3, kind: input, shape index: {}]   ;;  %s765_s4 = inlined_call_operand.vmem [shape: f32[1,128], index: 4, kind: input, shape index: {}]   ;;  %s766_s5 = inlined_call_operand.hbm [shape: bf16[128,128], index: 5, kind: input, shape index: {}]   ;;  %s767_s6 = inlined_call_operand.vmem [shape: f32[1,128], index: 6, kind: input, shape index: {}]   ;;  %s768_s7 = inlined_call_operand.hbm [shape: bf16[16,128], index: 7, kind: output, shape index: {}]  }
   0x1   :  { %13 = vsyncpa [#allocation6], 0 }
   0x2   :  { %14 = vsyncpa [#allocation9], 0 }
   0x3   :  { %15 = vsyncpa [#allocation4], 0  ;;  %s650_s24 = smov [#allocation5]  }
   0x4   :  { %s33_s25 = sshll.u32 %s650_s24, 4  ;;  %s34_s25 = int_to_ptr.vmem [resolvable:$true] %s33_s25 }
   0x5   :  { %s550_s26 = scalar_lea.vmem %s34_s25, 256  ;;  %p555_p1 = scmp.lt.s32.totalorder %s34_s25, %s34_s25 }
   0x6   :  { %p551_p0 = scmp.ne.s32.totalorder %s34_s25, %s550_s26  ;;  %p556_p2 = scmp.lt.s32.totalorder %s550_s26, %s550_s26 }
   0x8   :  { %p557_p3 = por %p556_p2, %p555_p1 }
   0xa   :  { %p558_p4 = pnand %p557_p3, %p551_p0 }
   0xc   :  { %561 = shalt.err (!%p558_p4)
}
   0xd   :  { %s651_s27 = smov 64   ;;  %s652_s28 = smov 4  }
   0xe   :  { %39 = dma.hbm_to_vmem [thread:$0]  %s762_s1, 256, %s34_s25, [#allocation6], %s651_s27, %s651_s27, %s652_s28  }
   0xf   :  { %s653_s8 = smov [#allocation2]  }
  0x10   :  { %s21_s9 = sshll.u32 %s653_s8, 4  ;;  %s22_s9 = int_to_ptr.vmem [resolvable:$true] %s21_s9 }
  0x11   :  { %s570_s10 = scalar_lea.vmem %s22_s9, 256  ;;  %p575_p6 = scmp.lt.s32.totalorder %s22_s9, %s22_s9 }
  0x12   :  { %p571_p5 = scmp.ne.s32.totalorder %s22_s9, %s570_s10  ;;  %p576_p7 = scmp.lt.s32.totalorder %s570_s10, %s570_s10 }
  0x14   :  { %p577_p8 = por %p576_p7, %p575_p6 }
  0x16   :  { %p578_p9 = pnand %p577_p8, %p571_p5 }
  0x18   :  { %581 = shalt.err (!%p578_p9)
}
  0x19   :  { %s654_s11 = smov 128   ;;  %s655_s12 = smov 8  }
  0x1a   :  { %27 = dma.hbm_to_vmem [thread:$0]  %s761_s0, 256, %s22_s9, [#allocation3], %s654_s11, %s654_s11, %s655_s12  }
  0x1b   :  { %s656_s15 = smov [#allocation7]   ;;  %s657_s17 = smov [#allocation8]  }
  0x1c   :  { %s47_s16 = sshll.u32 %s656_s15, 4  ;;  %s61_s1 = sshll.u32 %s657_s17, 4  ;;  %s48_s16 = int_to_ptr.vmem [resolvable:$true] %s47_s16  ;;  %s62_s1 = int_to_ptr.vmem [resolvable:$true] %s61_s1 }
  0x1d   :  { %s590_s18 = scalar_lea.vmem %s48_s16, 1024  ;;  %p595_p11 = scmp.lt.s32.totalorder %s48_s16, %s48_s16 }
  0x1e   :  { %p591_p10 = scmp.ne.s32.totalorder %s48_s16, %s590_s18  ;;  %p596_p12 = scmp.lt.s32.totalorder %s590_s18, %s590_s18 }
  0x20   :  { %p597_p13 = por %p596_p12, %p595_p11 }
  0x22   :  { %p598_p0 = pnand %p597_p13, %p591_p10 }
  0x24   :  { %601 = shalt.err (!%p598_p0)
}
  0x25   :  { %53 = dma.hbm_to_vmem [thread:$0]  %s764_s3, 1024, %s48_s16, [#allocation6], %s651_s27, %s651_s27, %s652_s28  }
  0x26   :  { %s610_s0 = scalar_lea.vmem %s62_s1, 1024  ;;  %p615_p2 = scmp.lt.s32.totalorder %s62_s1, %s62_s1 }
  0x27   :  { %p611_p1 = scmp.ne.s32.totalorder %s62_s1, %s610_s0  ;;  %p616_p3 = scmp.lt.s32.totalorder %s610_s0, %s610_s0 }
  0x29   :  { %p617_p4 = por %p616_p3, %p615_p2 }
  0x2b   :  { %p618_p5 = pnand %p617_p4, %p611_p1 }
  0x2d   :  { %621 = shalt.err (!%p618_p5)
}
  0x2e   :  { %67 = dma.hbm_to_vmem [thread:$0]  %s766_s5, 1024, %s62_s1, [#allocation9], %s651_s27, %s651_s27, %s652_s28  }
  0x2f   :  { %642 = dma.done.wait [#allocation3], 256  }
  0x30   :  { %643 = vsyncadd [#allocation3], 4294967040 }
  0x31   :  { %644 = dma.done.wait [#allocation6], 1280  }
  0x32   :  { %645 = vsyncadd [#allocation6], 4294966016 }
  0x33   :  { %646 = dma.done.wait [#allocation9], 1024  }
  0x34   :  { %647 = vsyncadd [#allocation9], 4294966272  ;;  %v658_v0 = vmov 0.0   ;;  %vm659_vm0 = vmmov 0   ;;  %v524_v1 = vld [vmem:[#allocation5 + $0x8] sm:$0xff]   ;;  %v525_v2 = vld [vmem:[#allocation5] sm:$0xff]  }
  0x35   :  { %465 = vmatprep.subr.bf16.mxu0 %v658_v0  ;;  %469 = vmatprep.mubr.msk.bf16.mxu0 %vm659_vm0, %v658_v0  ;;  %v83_v3 = vld [vmem:[#allocation2] sm:$0xff]  ;;  %v84_v4 = vld [vmem:[#allocation2 + $0x8] sm:$0xff]  ;;  %v526_v5 = vld [vmem:[#allocation7 + $0x38] sm:$0xff]   ;;  %vm109_vm1 = vcmask 261120   ;;  %s660_s26 = smov [#allocation10]  }
  0x36   :  { %473 = vmatprep.subr.bf16.mxu1 %v658_v0  ;;  %489 = vmatprep.mubr.msk.bf16.mxu1 %vm659_vm0, %v658_v0  ;;  %v85_v6 = vpack.c.bf16 %v84_v4, %v83_v3  ;;  %v527_v7 = vld [vmem:[#allocation7 + $0x30] sm:$0xff]   ;;  %v528_v8 = vld [vmem:[#allocation7 + $0x28] sm:$0xff]   ;;  %v529_v9 = vld [vmem:[#allocation7 + $0x20] sm:$0xff]   ;;  %s399_s29 = sshll.u32 %s660_s26, 4  ;;  %s400_s29 = int_to_ptr.vmem [resolvable:$true] %s399_s29 }
  0x37   :  { %466 = vmatpush3.bf16.msra.mxu0 %v524_v1  ;;  %474 = vmatpush3.bf16.msra.mxu1 %v526_v5  ;;  %v530_v10 = vld [vmem:[#allocation7 + $0x18] sm:$0xff]   ;;  %v531_v11 = vld [vmem:[#allocation7 + $0x10] sm:$0xff]   ;;  %v532_v12 = vld [vmem:[#allocation7 + $0x8] sm:$0xff]   ;;  %p627_p7 = scmp.lt.s32.totalorder %s400_s29, %s400_s29 }
  0x38   :  { %467 = vmatprep.subr.bf16.mxu0 %v658_v0  ;;  %475 = vmatprep.subr.bf16.mxu1 %v658_v0  ;;  %v533_v13 = vld [vmem:[#allocation7] sm:$0xff]   ;;  %v534_v14 = vld [vmem:[#allocation8 + $0x38] sm:$0xff]   ;;  %v535_v15 = vld [vmem:[#allocation8 + $0x30] sm:$0xff]  }
  0x39   :  { %v536_v16 = vld [vmem:[#allocation8 + $0x28] sm:$0xff]   ;;  %v537_v17 = vld [vmem:[#allocation8 + $0x20] sm:$0xff]   ;;  %v538_v18 = vld [vmem:[#allocation8 + $0x18] sm:$0xff]  }
  0x3a   :  { %v413_v19 = vld [vmem:[%s763_s2] ss:$0 sm:$0xff]  ;;  %v539_v29 = vld [vmem:[#allocation8 + $0x10] sm:$0xff]   ;;  %v540_v30 = vld [vmem:[#allocation8 + $0x8] sm:$0xff]  }
  0x3b   :  { %468 = vmatpush3.bf16.msra.mxu0 %v525_v2  ;;  %476 = vmatpush3.bf16.msra.mxu1 %v527_v7  ;;  %v541_v31 = vld [vmem:[#allocation8] sm:$0xff]  }
  0x3c   :  { %493 = vmatprep.subr.bf16.mxu0 %v658_v0  ;;  %477 = vmatprep.subr.bf16.mxu1 %v658_v0  ;;  %v417_v32 = vld [vmem:[%s765_s4] ss:$0 sm:$0xff]  ;;  %s622_s4 = scalar_lea.vmem %s400_s29, 128 }
  0x3d   :  { %v426_v43 = vld [vmem:[%s767_s6] ss:$0 sm:$0xff]  ;;  %p623_p6 = scmp.ne.s32.totalorder %s400_s29, %s622_s4  ;;  %p628_p8 = scmp.lt.s32.totalorder %s622_s4, %s622_s4 }
  0x3e   :  { %470 = vmatmul.mubr.msk.bf16.vlgmr.msra.gmra.mxu0 %vm109_vm1, %v85_v6 }
  0x3f   :  { %509 = vmatprep.mubr.msk.bf16.mxu0 %vm659_vm0, %v658_v0  ;;  %478 = vmatpush3.bf16.msra.mxu1 %v528_v8  ;;  %p629_p9 = por %p628_p8, %p627_p7 }
  0x40   :  { %479 = vmatprep.subr.bf16.mxu1 %v658_v0  ;;  %494 = vmatpush3.bf16.msra.mxu0 %v534_v14 }
  0x41   :  { %495 = vmatprep.subr.bf16.mxu0 %v658_v0  ;;  %p630_p10 = pnand %p629_p9, %p623_p6 }
  0x43   :  { %480 = vmatpush3.bf16.msra.mxu1 %v529_v9 }
  0x44   :  { %481 = vmatprep.subr.bf16.mxu1 %v658_v0  ;;  %496 = vmatpush3.bf16.msra.mxu0 %v535_v15 }
  0x45   :  { %497 = vmatprep.subr.bf16.mxu0 %v658_v0 }
  0x47   :  { %482 = vmatpush3.bf16.msra.mxu1 %v530_v10 }
  0x48   :  { %483 = vmatprep.subr.bf16.mxu1 %v658_v0  ;;  %498 = vmatpush3.bf16.msra.mxu0 %v536_v16 }
  0x49   :  { %499 = vmatprep.subr.bf16.mxu0 %v658_v0 }
  0x4b   :  { %484 = vmatpush3.bf16.msra.mxu1 %v531_v11 }
  0x4c   :  { %485 = vmatprep.subr.bf16.mxu1 %v658_v0  ;;  %500 = vmatpush3.bf16.msra.mxu0 %v537_v17 }
  0x4d   :  { %501 = vmatprep.subr.bf16.mxu0 %v658_v0 }
  0x4f   :  { %486 = vmatpush3.bf16.msra.mxu1 %v532_v12 }
  0x50   :  { %487 = vmatprep.subr.bf16.mxu1 %v658_v0  ;;  %502 = vmatpush3.bf16.msra.mxu0 %v538_v18 }
  0x51   :  { %503 = vmatprep.subr.bf16.mxu0 %v658_v0 }
  0x53   :  { %488 = vmatpush3.bf16.msra.mxu1 %v533_v13 }
  0x54   :  { %504 = vmatpush3.bf16.msra.mxu0 %v539_v29 }
  0x55   :  { %505 = vmatprep.subr.bf16.mxu0 %v658_v0 }
  0x58   :  { %506 = vmatpush3.bf16.msra.mxu0 %v540_v30 }
  0x59   :  { %507 = vmatprep.subr.bf16.mxu0 %v658_v0 }
  0x5c   :  { %508 = vmatpush3.bf16.msra.mxu0 %v541_v31 }
  0xfe   :  { %v147_v20 = vpop.f32.mrf.mxu0 }
  0xff   :  { %v148_v22 = vadd.f32 %v413_v19, %v147_v20 }
 0x100   :  { %v471_v21 = vpop.f32.mrf.mxu0 }
 0x101   :  { %v154_v26 = vmax.f32 %v148_v22, 0.0 }
 0x102   :  { %v150_v23 = vpop.f32.mrf.mxu0 }
 0x103   :  { %v151_v24 = vadd.f32 %v413_v19, %v150_v23 }
 0x104   :  { %v472_v25 = vpop.f32.mrf.mxu0 }
 0x105   :  { %v155_v27 = vmax.f32 %v151_v24, 0.0 }
 0x107   :  { %v156_v28 = vpack.c.bf16 %v155_v27, %v154_v26 }
 0x109   :  { %490 = vmatmul.mubr.bf16.vlgmr.msra.gmra.mxu1 %v156_v28 }
 0x1c9   :  { %v262_v33 = vpop.f32.mrf.mxu1 }
 0x1ca   :  { %v263_v35 = vadd.f32 %v417_v32, %v262_v33 }
 0x1cb   :  { %v491_v34 = vpop.f32.mrf.mxu1 }
 0x1cc   :  { %v269_v39 = vmax.f32 %v263_v35, 0.0 }
 0x1cd   :  { %v265_v36 = vpop.f32.mrf.mxu1 }
 0x1ce   :  { %v266_v37 = vadd.f32 %v417_v32, %v265_v36 }
 0x1cf   :  { %v492_v38 = vpop.f32.mrf.mxu1 }
 0x1d0   :  { %v270_v40 = vmax.f32 %v266_v37, 0.0 }
 0x1d2   :  { %v271_v41 = vpack.c.bf16 %v270_v40, %v269_v39 }
 0x1d4   :  { %510 = vmatmul.mubr.bf16.vlgmr.msra.gmra.mxu0 %v271_v41 }
 0x294   :  { %v377_v42 = vpop.f32.mrf.mxu0 }
 0x295   :  { %v378_v46 = vadd.f32 %v426_v43, %v377_v42 }
 0x296   :  { %v511_v44 = vpop.f32.mrf.mxu0 }
 0x298   :  { %v380_v45 = vpop.f32.mrf.mxu0 }
 0x299   :  { %v381_v47 = vadd.f32 %v426_v43, %v380_v45 }
 0x29a   :  { %v512_v48 = vpop.f32.mrf.mxu0 }
 0x29b   :  { %v442_v49 = vpack.c.bf16 %v381_v47, %v378_v46 }
 0x29d   :  { %443 = vst [vmem:[#allocation10] sm:$0xff] %v442_v49  }
 0x29e   :  { %633 = shalt.err (!%p630_p10)
}
 0x29f   :  { %405 = dma.vmem_to_hbm [thread:$0]  %s400_s29, 128, %s768_s7, [#allocation4], %s651_s27, %s651_s27, %s652_s28  }
 0x2a0   :  { %648 = dma.done.wait [#allocation4], 128  }
 0x2a1   :  { %649 = vsyncadd [#allocation4], 4294967168 }
 0x2a2   :  { %409 = vsyncpa [#allocation3], 1 }
 0x2a3   :  { %410 = vsyncpa [#allocation6], 1 }
 0x2a4   :  { %411 = vsyncpa [#allocation9], 1 }
 0x2a5   :  { %412 = vsyncpa [#allocation4], 1 }

</bundles_post_ra>
